<compile_context>
chip_gen: v6e
topology: v6e:2x2x1
jax: 0.10.0
libtpu: 0.0.40
codegen_flags: <defaults>
</compile_context>

<pallas_src>
import jax
import jax.numpy as jnp
from jax import lax
from jax.experimental import pallas as pl
from jax.experimental.pallas import tpu as pltpu


# -----------------------------------------------------------------------------
# Kernel 1: masked mean pooling over tokens  (== _compute_sentence_embedding)
# -----------------------------------------------------------------------------
def _pool_kernel(emb_ref, mask_ref, out_ref):
    emb = emb_ref[...]                                   # (TN, S, H)  encoder dtype (bf16/f32)
    m = mask_ref[...]                                    # (TN, 1, S)  f32, lane-dense
    # Masked token-sum as a batched (1,S)@(S,H) MXU matmul with f32 accumulation.
    summed = lax.dot_general(
        m.astype(emb.dtype), emb,
        dimension_numbers=(((2,), (1,)), ((0,), (0,))),
        preferred_element_type=jnp.float32)              # (TN, 1, H)
    count = jnp.sum(m, axis=2, keepdims=True)            # (TN, 1, 1)
    out_ref[...] = summed / count


def masked_mean_pool(token_emb, attn_mask, *,
                     vmem_budget_bytes=8 * 1024 * 1024, vmem_limit_bytes=None):
    """token_emb: (N, S, H) float (bf16 ok); attn_mask: (N, S) -> (N, H) f32."""
    N, S, H = token_emb.shape
    itemsize = jnp.dtype(token_emb.dtype).itemsize
    # Rows per grid step sized so the double-buffered inputs + output stay
    # under budget (well below the default scoped-VMEM limit on v5e/v6e/v7x).
    per_row = 2 * (S * H * itemsize + S * 4 + H * 4)
    tn = max(1, min(N, vmem_budget_bytes // per_row))
    if tn >= 8:
        tn = (tn // 8) * 8                               # sublane-aligned row tile

    mask3 = attn_mask.astype(jnp.float32).reshape(N, 1, S)

    out = pl.pallas_call(
        _pool_kernel,
        out_shape=jax.ShapeDtypeStruct((N, 1, H), jnp.float32),
        grid=(pl.cdiv(N, tn),),                          # ragged last block: no jnp.pad copy
        in_specs=[
            pl.BlockSpec((tn, S, H), lambda i: (i, 0, 0)),
            pl.BlockSpec((tn, 1, S), lambda i: (i, 0, 0)),
        ],
        out_specs=pl.BlockSpec((tn, 1, H), lambda i: (i, 0, 0)),
        compiler_params=pltpu.CompilerParams(
            dimension_semantics=("parallel",),
            vmem_limit_bytes=vmem_limit_bytes),
    )(token_emb, mask3)
    return out.reshape(N, H)


# -----------------------------------------------------------------------------
# Kernel 2: retrieval scores == (q.unsqueeze(1) @ corpus.transpose(-1,-2)).squeeze(1)
# -----------------------------------------------------------------------------
def _scores_kernel(q_ref, c_ref, out_ref):
    q = q_ref[0]                                         # (1, H)
    c = c_ref[0]                                         # (PT, H)
    # MXU contraction over H, lane-dense (1, PT) output.
    out_ref[0] = lax.dot_general(
        q, c, dimension_numbers=(((1,), (1,)), ((), ())),
        preferred_element_type=jnp.float32)


def retrieval_scores(q_emb, c_emb, *, profile_tile=512):
    B, H = q_emb.shape
    _, P, _ = c_emb.shape
    pt = min(P, profile_tile)

    out = pl.pallas_call(
        _scores_kernel,
        out_shape=jax.ShapeDtypeStruct((B, 1, P), jnp.float32),
        grid=(B, pl.cdiv(P, pt)),
        in_specs=[
            pl.BlockSpec((1, 1, H), lambda b, p: (b, 0, 0)),
            pl.BlockSpec((1, pt, H), lambda b, p: (b, p, 0)),
        ],
        out_specs=pl.BlockSpec((1, 1, pt), lambda b, p: (b, 0, p)),
        compiler_params=pltpu.CompilerParams(
            dimension_semantics=("parallel", "parallel")),
    )(q_emb.reshape(B, 1, H), c_emb)
    return out.reshape(B, P)


# -----------------------------------------------------------------------------
# Kernel 3: MLP decoder (Linear -> Tanh -> Linear -> Sigmoid) + masked_fill(~mask, 0)
# The (B*C, 2H) concat is never materialized: [q, cand] @ w1 == q@w1[:H] + cand@w1[H:]
# -----------------------------------------------------------------------------
def _mlp_kernel(q_ref, c_ref, w1q_ref, w1c_ref, b1_ref, w2_ref, b2_ref,
                mask_ref, out_ref):
    q = q_ref[0]                                         # (1, H)
    cand = c_ref[0]                                      # (CT, H)
    h = jnp.dot(q, w1q_ref[...], preferred_element_type=jnp.float32)        # (1, Dh)
    h = h + jnp.dot(cand, w1c_ref[...], preferred_element_type=jnp.float32) # (CT, Dh)
    h = jnp.tanh(h + b1_ref[...])
    # Second Linear (Dh -> 1) as (1,Dh) x (CT,Dh)^T contraction: lane-dense (1, CT)
    # result, no width-1 stores and no in-kernel transpose.
    y = lax.dot_general(
        w2_ref[...], h, dimension_numbers=(((1,), (1,)), ((), ())),
        preferred_element_type=jnp.float32)              # (1, CT)
    y = jax.nn.sigmoid(y + b2_ref[...])
    m = mask_ref[0]                                      # (1, CT)
    out_ref[0] = jnp.where(m > 0.5, y, 0.0)              # masked_fill(~mask, 0.0)


def mlp_decode(params, q_emb, cand_emb, cand_mask, *, cand_tile=128):
    B, H = q_emb.shape
    _, C, _ = cand_emb.shape
    dh = params["w1"].shape[1]
    w1q = params["w1"][:H, :]
    w1c = params["w1"][H:, :]
    b1 = params["b1"].reshape(1, dh)
    w2 = params["w2"].reshape(1, dh)
    b2 = params["b2"].reshape(1, 1)

    ct = min(C, cand_tile)
    mask3 = cand_mask.astype(jnp.float32).reshape(B, 1, C)   # lane-dense mask layout

    out = pl.pallas_call(
        _mlp_kernel,
        out_shape=jax.ShapeDtypeStruct((B, 1, C), jnp.float32),
        grid=(B, pl.cdiv(C, ct)),
        in_specs=[
            pl.BlockSpec((1, 1, H), lambda b, c: (b, 0, 0)),    # query embedding row
            pl.BlockSpec((1, ct, H), lambda b, c: (b, c, 0)),   # candidate embeddings
            pl.BlockSpec((H, dh), lambda b, c: (0, 0)),         # w1[:H]   (resident)
            pl.BlockSpec((H, dh), lambda b, c: (0, 0)),         # w1[H:]   (resident)
            pl.BlockSpec((1, dh), lambda b, c: (0, 0)),         # b1       (resident)
            pl.BlockSpec((1, dh), lambda b, c: (0, 0)),         # w2 row   (resident)
            pl.BlockSpec((1, 1), lambda b, c: (0, 0)),          # b2       (resident)
            pl.BlockSpec((1, 1, ct), lambda b, c: (b, 0, c)),   # candidate mask (lane-dense)
        ],
        out_specs=pl.BlockSpec((1, 1, ct), lambda b, c: (b, 0, c)),
        compiler_params=pltpu.CompilerParams(
            dimension_semantics=("parallel", "parallel")),
    )(q_emb.reshape(B, 1, H), cand_emb, w1q, w1c, b1, w2, b2, mask3)
    return out.reshape(B, C)


# -----------------------------------------------------------------------------
# Forward pass (top-k + gathers in plain JAX glue; hot paths in Pallas kernels)
# -----------------------------------------------------------------------------
def profile_score_forward(params, n_candidates,
                          query_tok_emb, query_attn_mask,
                          corpus_tok_emb, corpus_attn_mask, profile_mask):
    B, P, S, H = corpus_tok_emb.shape
    C = min(n_candidates, P)

    # sentence embeddings (masked mean pooling) — Pallas
    q_emb = masked_mean_pool(query_tok_emb, query_attn_mask)                   # (B, H)
    c_emb = masked_mean_pool(
        corpus_tok_emb.reshape(B * P, S, H),
        corpus_attn_mask.reshape(B * P, S),
    ).reshape(B, P, H)                                                         # (B, P, H)

    # retrieval scores — Pallas
    scores = retrieval_scores(q_emb, c_emb)                                    # (B, P)

    # top-k candidate selection + gathers — plain JAX glue
    # TODO(synk): the candidate gather could be fused into the MLP kernel via
    # PrefetchScalarGridSpec + pl.Element row indexing; kept as JAX glue here.
    _, cand_idx = jax.lax.top_k(scores, C)                                     # (B, C)
    cand_emb = jnp.take_along_axis(c_emb, cand_idx[:, :, None], axis=1)        # (B, C, H)
    cand_mask = jnp.take_along_axis(profile_mask, cand_idx, axis=1)            # (B, C) bool

    # MLP decoder + masking — Pallas (no (B*C, 2H) concat materialized)
    lik = mlp_decode(params, q_emb, cand_emb, cand_mask)                       # (B, C)
    return lik, cand_mask, cand_idx


# -----------------------------------------------------------------------------
# Pure-JAX reference for correctness checking
# -----------------------------------------------------------------------------
def reference_forward(params, n_candidates, q_tok, q_mask, c_tok, c_mask, pmask):
    def pool(emb, m):
        emb = emb.astype(jnp.float32)
        m = m.astype(jnp.float32)[..., None]
        return jnp.sum(emb * m, axis=1) / jnp.sum(m, axis=1)

    B, P, S, H = c_tok.shape
    C = min(n_candidates, P)
    q = pool(q_tok, q_mask)
    c = pool(c_tok.reshape(B * P, S, H), c_mask.reshape(B * P, S)).reshape(B, P, H)
    scores = jnp.einsum("bh,bph->bp", q, c)
    _, idx = jax.lax.top_k(scores, C)
    ce = jnp.take_along_axis(c, idx[:, :, None], axis=1)
    qe = jnp.broadcast_to(q[:, None, :], (B, C, H))
    qc = jnp.concatenate([qe, ce], axis=-1)
    h = jnp.tanh(qc @ params["w1"] + params["b1"])
    y = jax.nn.sigmoid(h @ params["w2"] + params["b2"])[..., 0]
    cm = jnp.take_along_axis(pmask, idx, axis=1)
    return jnp.where(cm, y, 0.0), cm, idx


if __name__ == "__main__":
    B, P, S, H = 2, 8, 8, 32          # batch, n_profiles, seq_len, encoder hidden
    N_CAND, DEC_HID = 4, 16           # n_candidates, decoder hidden_size
    DIN = 2 * H                       # decoder_input_size

    key = jax.random.PRNGKey(0)
    k1, k2, k3, k4, k5, k6, k7, k8 = jax.random.split(key, 8)

    # synthetic frozen-encoder outputs (bf16, as a TPU BERT encoder would emit)
    query_tok_emb = jax.random.normal(k1, (B, S, H), jnp.float32).astype(jnp.bfloat16)
    corpus_tok_emb = jax.random.normal(k2, (B, P, S, H), jnp.float32).astype(jnp.bfloat16)

    # attention masks with variable valid lengths (>= 2 tokens each)
    pos = jnp.arange(S)
    q_len = jax.random.randint(k3, (B,), 2, S + 1)
    c_len = jax.random.randint(k4, (B, P), 2, S + 1)
    query_attn_mask = (pos[None, :] < q_len[:, None]).astype(jnp.float32)
    corpus_attn_mask = (pos[None, None, :] < c_len[:, :, None]).astype(jnp.float32)

    profile_mask = jax.random.bernoulli(k5, 0.8, (B, P))                # bool

    # deterministic decoder parameters (synthetic; (in, out) layout)
    params = {
        "w1": jax.random.normal(k6, (DIN, DEC_HID), jnp.float32) / jnp.sqrt(DIN),
        "b1": 0.05 * jax.random.normal(k8, (1, DEC_HID), jnp.float32),
        "w2": jax.random.normal(k7, (DEC_HID, 1), jnp.float32) / jnp.sqrt(DEC_HID),
        "b2": jnp.full((1, 1), 0.1, jnp.float32),
    }

    lik, cand_mask, cand_idx = profile_score_forward(
        params, N_CAND, query_tok_emb, query_attn_mask,
        corpus_tok_emb, corpus_attn_mask, profile_mask)
    jax.block_until_ready((lik, cand_mask, cand_idx))

    ref_lik, ref_mask, ref_idx = reference_forward(
        params, N_CAND, query_tok_emb, query_attn_mask,
        corpus_tok_emb, corpus_attn_mask, profile_mask)

    assert lik.shape == (B, N_CAND)
    assert cand_mask.shape == (B, N_CAND) and cand_idx.shape == (B, N_CAND)
    assert bool(jnp.all(cand_idx == ref_idx))
    assert bool(jnp.all(cand_mask == ref_mask))
    assert jnp.allclose(lik, ref_lik, atol=1e-4, rtol=1e-4)
    print("KERNEL_OK")
</pallas_src>

<mosaic_0001>
module attributes {stable_mosaic.version = 11 : i64} {
  func.func @_pool_kernel(%arg0: i32, %arg1: memref<2x8x32xbf16, #tpu.memory_space<vmem>>, %arg2: memref<2x1x8xf32, #tpu.memory_space<vmem>>, %arg3: memref<2x1x32xf32, #tpu.memory_space<vmem>>) attributes {dimension_semantics = [#tpu.dimension_semantics<parallel>], iteration_bounds = array<i64: 1>, scalar_prefetch = 0 : i64, scratch_operands = 0 : i64, tpu.core_type = #tpu.core_type<tc>, window_params = [{transform_indices = @transform_0, window_bounds = array<i64: 2, 8, 32>}, {transform_indices = @transform_1, window_bounds = array<i64: 2, 1, 8>}, {transform_indices = @transform_2, window_bounds = array<i64: 2, 1, 32>}]} {
    %c0 = arith.constant 0 : index
    %c0_0 = arith.constant 0 : index
    %c0_1 = arith.constant 0 : index
    %0 = vector.load %arg1[%c0, %c0_0, %c0_1] : memref<2x8x32xbf16, #tpu.memory_space<vmem>>, vector<2x8x32xbf16>
    %c0_2 = arith.constant 0 : index
    %c0_3 = arith.constant 0 : index
    %c0_4 = arith.constant 0 : index
    %1 = vector.load %arg2[%c0_2, %c0_3, %c0_4] : memref<2x1x8xf32, #tpu.memory_space<vmem>>, vector<2x1x8xf32>
    %2 = arith.truncf %1 : vector<2x1x8xf32> to vector<2x1x8xbf16>
    %cst = arith.constant dense<0.000000e+00> : vector<2x1x32xf32>
    %3 = tpu.matmul %2, %0, %cst {dimension_numbers = #tpu.dot_dimension_numbers<[2], [1], [1], [2], [0, 0, 0, 1, 1, 2], [0], [0]>} : vector<2x1x8xbf16>, vector<2x8x32xbf16>, vector<2x1x32xf32> -> vector<2x1x32xf32>
    %cst_5 = arith.constant dense<0.000000e+00> : vector<2x1xf32>
    %4 = vector.multi_reduction <add>, %1, %cst_5 [2] : vector<2x1x8xf32> to vector<2x1xf32>
    %5 = vector.shape_cast %4 : vector<2x1xf32> to vector<2x1x1xf32>
    %6 = vector.broadcast %5 : vector<2x1x1xf32> to vector<2x1x32xf32>
    %7 = arith.divf %3, %6 : vector<2x1x32xf32>
    %c0_6 = arith.constant 0 : index
    %c0_7 = arith.constant 0 : index
    %c0_8 = arith.constant 0 : index
    %8 = vector.load %arg3[%c0_6, %c0_7, %c0_8] : memref<2x1x32xf32, #tpu.memory_space<vmem>>, vector<2x1x32xf32>
    tpu.vector_store %arg3[%c0_6, %c0_7, %c0_8], %7 {strides = array<i32>} : memref<2x1x32xf32, #tpu.memory_space<vmem>>, vector<2x1x32xf32>,
    return
  }
  func.func @transform_0(%arg0: i32) -> (i32, i32, i32) {
    %c0_i32 = arith.constant 0 : i32
    %c0_i32_0 = arith.constant 0 : i32
    %c0_i32_1 = arith.constant 0 : i32
    return %arg0, %c0_i32, %c0_i32_0 : i32, i32, i32
  }
  func.func @transform_1(%arg0: i32) -> (i32, i32, i32) {
    %c0_i32 = arith.constant 0 : i32
    %c0_i32_0 = arith.constant 0 : i32
    %c0_i32_1 = arith.constant 0 : i32
    return %arg0, %c0_i32, %c0_i32_0 : i32, i32, i32
  }
  func.func @transform_2(%arg0: i32) -> (i32, i32, i32) {
    %c0_i32 = arith.constant 0 : i32
    %c0_i32_0 = arith.constant 0 : i32
    %c0_i32_1 = arith.constant 0 : i32
    return %arg0, %c0_i32, %c0_i32_0 : i32, i32, i32
  }
}

</mosaic_0001>

<bundles_post_ra>
// kernel: tpu_custom_call.1
= control target key start
LH: loop header
LB: loop body
LE: loop exit
PB: predicated region body
PF: predicated region fallthrough
CT: control target
= control target key end

     0   :  { %7 = vsyncpa [#allocation3], 0  ;;  %s309_s0 = inlined_call_operand.hbm [shape: bf16[2,8,32], index: 0, kind: input, shape index: {}]   ;;  %s310_s1 = inlined_call_operand.hbm [shape: f32[2,1,8], index: 1, kind: input, shape index: {}]   ;;  %s311_s2 = inlined_call_operand.hbm [shape: f32[2,1,32], index: 2, kind: output, shape index: {}]  }
   0x1   :  { %8 = vsyncpa [#allocation6], 0 }
   0x2   :  { %9 = vsyncpa [#allocation4], 0  ;;  %s270_s9 = smov [#allocation2]  }
   0x3   :  { %s15_s10 = sshll.u32 %s270_s9, 4  ;;  %s16_s10 = int_to_ptr.vmem [resolvable:$true] %s15_s10 }
   0x4   :  { %s212_s11 = scalar_lea.vmem %s16_s10, 128  ;;  %p217_p1 = scmp.lt.s32.totalorder %s16_s10, %s16_s10 }
   0x5   :  { %p213_p0 = scmp.ne.s32.totalorder %s16_s10, %s212_s11  ;;  %p218_p2 = scmp.lt.s32.totalorder %s212_s11, %s212_s11 }
   0x7   :  { %p219_p3 = por %p218_p2, %p217_p1 }
   0x9   :  { %p220_p4 = pnand %p219_p3, %p213_p0 }
   0xb   :  { %223 = shalt.err (!%p220_p4)
}
   0xc   :  { %s271_s12 = smov 64   ;;  %s272_s13 = smov 4  }
   0xd   :  { %21 = dma.hbm_to_vmem [thread:$0]  %s309_s0, 128, %s16_s10, [#allocation3], %s271_s12, %s271_s12, %s272_s13  }
   0xe   :  { %s273_s16 = smov [#allocation5]  }
   0xf   :  { %s27_s17 = sshll.u32 %s273_s16, 4  ;;  %s28_s17 = int_to_ptr.vmem [resolvable:$true] %s27_s17 }
  0x10   :  { %s232_s18 = scalar_lea.vmem %s28_s17, 32  ;;  %p237_p6 = scmp.lt.s32.totalorder %s28_s17, %s28_s17 }
  0x11   :  { %p233_p5 = scmp.ne.s32.totalorder %s28_s17, %s232_s18  ;;  %p238_p7 = scmp.lt.s32.totalorder %s232_s18, %s232_s18 }
  0x13   :  { %p239_p8 = por %p238_p7, %p237_p6 }
  0x15   :  { %p240_p9 = pnand %p239_p8, %p233_p5 }
  0x17   :  { %243 = shalt.err (!%p240_p9)
}
  0x18   :  { %s274_s19 = smov 16   ;;  %s275_s20 = smov 1  }
  0x19   :  { %33 = dma.hbm_to_vmem [thread:$0]  %s310_s1, 32, %s28_s17, [#allocation6], %s274_s19, %s274_s19, %s275_s20  }
  0x1a   :  { %264 = dma.done.wait [#allocation3], 128  }
  0x1b   :  { %265 = vsyncadd [#allocation3], 4294967168 }
  0x1c   :  { %266 = dma.done.wait [#allocation6], 32  }
  0x1d   :  { %267 = vsyncadd [#allocation6], 4294967264  ;;  %v276_v0 = vmov 0.0   ;;  %vm277_vm0 = vmmov 0   ;;  %vm51_vm1 = vcmask 1043456   ;;  %vm141_vm2 = vcmask 57344  }
  0x1e   :  { %179 = vmatprep.subr.bf16.mxu0 %v276_v0  ;;  %185 = vmatprep.subr.bf16.mxu1 %v276_v0  ;;  %v41_v1 = vld [vmem:[#allocation2] sm:$0xf]  ;;  %v42_v2 = vld [vmem:[#allocation2 + $0x4] sm:$0xf]  ;;  %v43_v3 = vld [vmem:[#allocation5] sm:$0x1] }
  0x1f   :  { %181 = vmatprep.mubr.msk.bf16.mxu0 %vm277_vm0, %v276_v0  ;;  %187 = vmatprep.mubr.msk.bf16.mxu1 %vm277_vm0, %v276_v0  ;;  %v53_v4 = vsel %vm51_vm1, %v41_v1, 0  ;;  %v99_v5 = vsel %vm51_vm1, %v42_v2, 0  ;;  %v45_v6 = vpack.c.bf16 %v43_v3, %v43_v3  ;;  %v44_v7 = vld [vmem:[#allocation5 + $0x1] sm:$0x1]  ;;  %v142_v8 = vsel %vm141_vm2, %v43_v3, 0.0  ;;  %s278_s0 = smov [#allocation7]  }
  0x20   :  { %180 = vmatpush3.bf16.msra.mxu0 %v53_v4  ;;  %186 = vmatpush3.bf16.msra.mxu1 %v99_v5  ;;  %vm47_vm3 = vcmask 64512   ;;  %v46_v9 = vpack.c.bf16 %v44_v7, %v44_v7  ;;  %v145_v10 = vsel %vm141_vm2, %v44_v7, 0.0  ;;  %s160_s1 = sshll.u32 %s278_s0, 4  ;;  %vm152_vm4 = vcmask 253952   ;;  %s161_s1 = int_to_ptr.vmem [resolvable:$true] %s160_s1 }
  0x21   :  { %143 = vadd.xlane.f32.xlu0 %v142_v8  ;;  %s244_s23 = scalar_lea.vmem %s161_s1, 32  ;;  %p249_p11 = scmp.lt.s32.totalorder %s161_s1, %s161_s1 }
  0x22   :  { %p245_p10 = scmp.ne.s32.totalorder %s161_s1, %s244_s23  ;;  %p250_p12 = scmp.lt.s32.totalorder %s244_s23, %s244_s23 }
  0x23   :  { %182 = vmatmul.mubr.msk.bf16.vlgmr.msra.gmra.mxu0 %vm47_vm3, %v45_v6  ;;  %188 = vmatmul.mubr.msk.bf16.vlgmr.msra.gmra.mxu1 %vm47_vm3, %v46_v9 }
  0x24   :  { %p251_p13 = por %p250_p12, %p249_p11 }
  0x25   :  { %146 = vadd.xlane.f32.xlu0 %v145_v10 }
  0x26   :  { %p252_p0 = pnand %p251_p13, %p245_p10 }
  0xaa   :  { %v144_v11 = vpop.xlane.xlu0 %143 }
  0xae   :  { %v147_v12 = vpop.xlane.xlu0 %146 }
  0xaf   :  { %200 = vrcp.f32 %v147_v12 }
  0xb0   :  { %202 = vrcp.f32 %v144_v11 }
  0xbc   :  { %v201_v13 = vpop.eup %200 }
  0xbd   :  { %v203_v14 = vpop.eup %202 }
  0xe3   :  { %v89_v15 = vpop.f32.mrf.mxu0  ;;  %v135_v16 = vpop.f32.mrf.mxu1 }
  0xe4   :  { %v149_v17 = vmul.f32 %v203_v14, %v89_v15  ;;  %v151_v18 = vmul.f32 %v201_v13, %v135_v16 }
  0xe5   :  { %v183_v19 = vpop.f32.mrf.mxu0  ;;  %v189_v20 = vpop.f32.mrf.mxu1 }
  0xe6   :  { %153 = vst.msk [vmem:[#allocation7] sm:$0x1] %vm152_vm4, %v149_v17  ;;  %154 = vst.msk [vmem:[#allocation7 + $0x1] sm:$0x1] %vm152_vm4, %v151_v18 }
  0xe7   :  { %v92_v21 = vpop.f32.mrf.mxu0  ;;  %v138_v22 = vpop.f32.mrf.mxu1 }
  0xe8   :  { %255 = shalt.err (!%p252_p0)
}
  0xe9   :  { %166 = dma.vmem_to_hbm [thread:$0]  %s161_s1, 32, %s311_s2, [#allocation4], %s274_s19, %s274_s19, %s275_s20   ;;  %v184_v23 = vpop.f32.mrf.mxu0  ;;  %v190_v24 = vpop.f32.mrf.mxu1 }
  0xea   :  { %268 = dma.done.wait [#allocation4], 32  }
  0xeb   :  { %269 = vsyncadd [#allocation4], 4294967264 }
  0xec   :  { %170 = vsyncpa [#allocation3], 1 }
  0xed   :  { %171 = vsyncpa [#allocation6], 1 }
  0xee   :  { %172 = vsyncpa [#allocation4], 1 }

</bundles_post_ra>
